<compile_context>
chip_gen: v6e
topology: v6e:2x2x1
jax: 0.10.0
libtpu: 0.0.40
codegen_flags: <defaults>
</compile_context>

<pallas_src>
import jax
import jax.numpy as jnp
from jax import lax
from jax.experimental import pallas as pl
from jax.experimental.pallas import tpu as pltpu


_LANE = 128
_SUBLANE = 8


def _round_up(a, m):
    return (a + m - 1) // m * m


def _pad2d(a, rows, cols, dtype=None):
    r, c = a.shape
    a = jnp.pad(a, ((0, rows - r), (0, cols - c)))
    return a.astype(dtype) if dtype is not None else a


def event_vqvae_kernel(x_ref, w1_ref, b1_ref, w2_ref, b2_ref, cb_ref,
                       wd_ref, bd_ref, kmask_ref,
                       x_tilde_ref, z_e_ref, z_q_ref, logits_ref):
    """Fused encoder -> VQ argmax lookup -> decoder for one batch tile.

    Matmul operands are bf16 (full-rate MXU on v5e/v6e/v7x); accumulation is f32
    via preferred_element_type.  Feature dims are lane-padded to 128 by the
    wrapper so output stores are unmasked and lane-dense.
    """
    x = x_ref[...]                                       # (bm, Ip) bf16
    b1 = b1_ref[...]                                     # (1, Dp) f32
    b2 = b2_ref[...]                                     # (1, Dp) f32
    bd = bd_ref[...]                                     # (1, Ip) f32
    cb = cb_ref[...]                                     # (Kp, Dp) bf16

    # --- encoder MLP: Linear -> ReLU -> Linear --------------------------------
    h = jnp.dot(x, w1_ref[...], preferred_element_type=jnp.float32) + b1
    h = jnp.maximum(h, 0.0).astype(jnp.bfloat16)
    z_e = jnp.dot(h, w2_ref[...], preferred_element_type=jnp.float32) + b2

    # --- codebook logits: contract over `dim` directly (no cb transpose) -----
    logits = lax.dot_general(
        z_e.astype(jnp.bfloat16), cb,
        dimension_numbers=(((1,), (1,)), ((), ())),
        preferred_element_type=jnp.float32)              # (bm, Kp)

    # Precomputed additive pad mask (0 for real columns, -1e30 for lane padding):
    # one broadcast add instead of iota + compare + where passes over (bm, Kp).
    logits = logits + kmask_ref[...]

    # argmax(softmax(logits)) == argmax(logits) (softmax is monotone per row).
    # First-occurrence tie-break (min index among maxima), built from a single
    # (1, Kp) iota so no (bm, Kp) int32 index tensor is materialized.
    kp = logits.shape[1]
    col = lax.broadcasted_iota(jnp.int32, (1, kp), 1)    # (1, Kp)
    maxv = jnp.max(logits, axis=1, keepdims=True)        # (bm, 1)
    idx = jnp.min(jnp.where(logits == maxv, col, kp), axis=1, keepdims=True)
    onehot = (col == idx).astype(cb.dtype)               # (bm, Kp) bf16 one-hot

    # index_select(codebook, idx) as a one-hot matmul (MXU-friendly, no gather).
    z_q = jnp.dot(onehot, cb, preferred_element_type=jnp.float32)   # (bm, Dp)

    # --- decoder Linear(dim -> input_dim) -------------------------------------
    x_tilde = jnp.dot(z_q.astype(jnp.bfloat16), wd_ref[...],
                      preferred_element_type=jnp.float32) + bd

    x_tilde_ref[...] = x_tilde
    z_e_ref[...] = z_e
    z_q_ref[...] = z_q
    logits_ref[...] = logits


def prepare_params(params):
    """Pad / bf16-cast the weights ONCE (hoisted out of the per-call forward).

    Re-padding every forward re-reads and re-writes every weight in XLA ops around
    the custom call; for large codebooks that extra HBM traffic rivals the kernel's.
    """
    w1, b1, w2, b2, cb, wd, bd = params
    input_dim, dim = w1.shape
    K = cb.shape[0]

    Ip = _round_up(input_dim, _LANE)
    Dp = _round_up(dim, _LANE)
    Kp = _round_up(K, _LANE)

    bf16, f32 = jnp.bfloat16, jnp.float32
    kmask = jnp.where(jnp.arange(Kp) < K, 0.0, -1e30).astype(f32).reshape(1, Kp)

    return dict(
        w1=_pad2d(w1, Ip, Dp, bf16), b1=_pad2d(b1, 1, Dp, f32),
        w2=_pad2d(w2, Dp, Dp, bf16), b2=_pad2d(b2, 1, Dp, f32),
        cb=_pad2d(cb, Kp, Dp, bf16),
        wd=_pad2d(wd, Dp, Ip, bf16), bd=_pad2d(bd, 1, Ip, f32),
        kmask=kmask,
        dims=(input_dim, dim, K, Ip, Dp, Kp),
    )


def event_vqvae_forward(x, known_mask, prepared, labels=None):
    """Pallas wrapper.  known_mask / labels are unused when use_vae=False
    (matches the PyTorch forward).  `prepared` comes from prepare_params()."""
    del known_mask, labels
    input_dim, dim, K, Ip, Dp, Kp = prepared["dims"]
    B = x.shape[0]
    bf16, f32 = jnp.bfloat16, jnp.float32

    Bp = _round_up(B, _SUBLANE)

    # ---- VMEM accounting (bytes) --------------------------------------------
    # Constant-index inputs are single-buffered (pl.Buffered(1)); the x tile and
    # the four f32 output tiles are double-buffered by the pipeline.
    const_bytes = (2 * (Ip * Dp + Dp * Dp + Kp * Dp + Dp * Ip)          # bf16 weights
                   + 4 * _SUBLANE * (2 * Dp + Ip + Kp))                 # 1-row f32 arrays
    row_bytes = 2 * (2 * Ip + 4 * (Ip + 2 * Dp + Kp))                   # per batch row, 2x-buf

    # Conservative per-step budget that fits v5e/v6e (128 MiB) and v7x (64 MiB/TC)
    # once vmem_limit_bytes is raised explicitly below.
    budget = 40 << 20
    bm_cap = max(_SUBLANE,
                 (budget - const_bytes) // row_bytes // _SUBLANE * _SUBLANE)
    bm = min(512, Bp, bm_cap)
    if Bp >= 256:
        # >=4 grid steps: >=2 per TensorCore on v7x megacore, so the x prefetch and
        # the (dominant) f32 output writeback stay overlapped with compute.
        bm = min(bm, _round_up(pl.cdiv(Bp, 4), _SUBLANE))
    bm = max(_SUBLANE, bm)
    grid_m = pl.cdiv(Bp, bm)          # tiny batches (demo size) -> single step
    Bp = grid_m * bm
    grid = (grid_m,)

    x_p = _pad2d(x, Bp, Ip).astype(bf16)

    # Explicit scoped-VMEM limit (defaults are 16 MiB on v5e / 32 MiB on v6e/v7x).
    # Capped at 64 MiB so the request stays within v7x physical VMEM per TC.
    vmem_limit = int(min(64 << 20,
                         max(8 << 20,
                             (const_bytes + bm * row_bytes) * 3 // 2 + (2 << 20))))

    def const_spec(shape):
        # Block never changes across grid steps -> single pipeline buffer.
        return pl.BlockSpec(shape, lambda i: (0,) * len(shape),
                            pipeline_mode=pl.Buffered(1))

    def batch_spec(cols):
        return pl.BlockSpec((bm, cols), lambda i: (i, 0))

    # Outputs kept f32 to preserve the module's numerics (x_tilde feeds the recon
    # loss, z_e/z_q feed VQ/commitment losses).  bf16 outputs would roughly halve
    # the HBM writeback in this writeback-bound regime if downstream code allows.
    out_shapes = (
        jax.ShapeDtypeStruct((Bp, Ip), f32),   # x_tilde
        jax.ShapeDtypeStruct((Bp, Dp), f32),   # z_e_x
        jax.ShapeDtypeStruct((Bp, Dp), f32),   # z_q_x
        jax.ShapeDtypeStruct((Bp, Kp), f32),   # logits
    )

    flops = 2 * Bp * (Ip * Dp + Dp * Dp + 2 * Kp * Dp + Dp * Ip)
    bytes_accessed = const_bytes + 2 * Bp * Ip + 4 * Bp * (Ip + 2 * Dp + Kp)
    cost = pl.CostEstimate(flops=flops, transcendentals=0,
                           bytes_accessed=bytes_accessed)

    x_tilde, z_e_x, z_q_x, logits = pl.pallas_call(
        event_vqvae_kernel,
        out_shape=out_shapes,
        grid=grid,
        in_specs=[
            batch_spec(Ip),             # x               (Bp, Ip)  bf16
            const_spec((Ip, Dp)),       # encoder W1                bf16
            const_spec((1, Dp)),        # encoder b1                f32
            const_spec((Dp, Dp)),       # encoder W2                bf16
            const_spec((1, Dp)),        # encoder b2                f32
            const_spec((Kp, Dp)),       # codebook                  bf16
            const_spec((Dp, Ip)),       # decoder W                 bf16
            const_spec((1, Ip)),        # decoder b                 f32
            const_spec((1, Kp)),        # additive pad mask row     f32
        ],
        out_specs=[
            batch_spec(Ip),
            batch_spec(Dp),
            batch_spec(Dp),
            batch_spec(Kp),
        ],
        compiler_params=pltpu.CompilerParams(
            dimension_semantics=("parallel",),
            vmem_limit_bytes=vmem_limit),
        cost_estimate=cost,
    )(x_p, prepared["w1"], prepared["b1"], prepared["w2"], prepared["b2"],
      prepared["cb"], prepared["wd"], prepared["bd"], prepared["kmask"])

    kl_div = 0.0
    return (x_tilde[:B, :input_dim], z_e_x[:B, :dim],
            z_q_x[:B, :dim], logits[:B, :K], kl_div)


def init_params(key, input_dim, dim, types_n):
    """Deterministic synthetic parameter init (shapes match the nn.Module)."""
    k1, k2, k3, k4, k5, k6, k7 = jax.random.split(key, 7)
    w1 = jax.random.normal(k1, (input_dim, dim), jnp.float32) * 0.1
    b1 = jax.random.normal(k5, (1, dim), jnp.float32) * 0.05
    w2 = jax.random.normal(k2, (dim, dim), jnp.float32) * 0.1
    b2 = jax.random.normal(k6, (1, dim), jnp.float32) * 0.05
    # nn.Embedding(K, D).weight.uniform_(-1/K, 1/K)
    cb = jax.random.uniform(k3, (types_n, dim), jnp.float32,
                            minval=-1.0 / types_n, maxval=1.0 / types_n)
    # nn.Linear(dim, input_dim): stored transposed as (dim, input_dim)
    wd = jax.random.normal(k4, (dim, input_dim), jnp.float32) * 0.1
    bd = jax.random.normal(k7, (1, input_dim), jnp.float32) * 0.05
    return (w1, b1, w2, b2, cb, wd, bd)


def reference_forward(x, params):
    """Pure-JAX reference mirroring the kernel's bf16-operand / f32-accumulate math."""
    w1, b1, w2, b2, cb, wd, bd = params
    bf = lambda a: a.astype(jnp.bfloat16).astype(jnp.float32)
    xb, w1b, w2b, cbb, wdb = bf(x), bf(w1), bf(w2), bf(cb), bf(wd)
    h = jnp.maximum(xb @ w1b + b1, 0.0)
    z_e = bf(h) @ w2b + b2
    logits = bf(z_e) @ cbb.T
    idx = jnp.argmax(logits, axis=1)          # first occurrence, like torch.max
    z_q = cbb[idx]
    x_tilde = bf(z_q) @ wdb + bd
    return x_tilde, z_e, z_q, logits


if __name__ == "__main__":
    # small shapes consistent with the module: batch=16, input_dim=16, dim=32,
    # known_types=4, unknown_types=4 -> K=8
    B, input_dim, dim = 16, 16, 32
    known_types, unknown_types = 4, 4
    types_n = known_types + unknown_types

    key = jax.random.PRNGKey(0)
    kx, kp = jax.random.split(key)
    x = jax.random.normal(kx, (B, input_dim), jnp.float32)
    known_mask = jnp.zeros((B,), jnp.int32)   # unused in the use_vae=False path
    params = init_params(kp, input_dim, dim, types_n)

    # Pad / cast the weights once (hoisted out of the per-call forward).
    prepared = prepare_params(params)

    x_tilde, z_e_x, z_q_x, logits, kl_div = event_vqvae_forward(x, known_mask, prepared)
    jax.block_until_ready((x_tilde, z_e_x, z_q_x, logits))

    # sanity check against the pure-JAX reference (same bf16/f32 math)
    r_xt, r_ze, r_zq, r_lg = reference_forward(x, params)
    assert jnp.allclose(x_tilde, r_xt, rtol=1e-2, atol=1e-2)
    assert jnp.allclose(z_e_x, r_ze, rtol=1e-2, atol=1e-2)
    assert jnp.allclose(z_q_x, r_zq, rtol=1e-2, atol=1e-2)
    assert jnp.allclose(logits, r_lg, rtol=1e-2, atol=1e-2)
    assert kl_div == 0.0

    print("KERNEL_OK")
</pallas_src>

<mosaic_0001>
module attributes {stable_mosaic.version = 11 : i64} {
  func.func @event_vqvae_kernel(%arg0: i32, %arg1: memref<16x128xbf16, #tpu.memory_space<vmem>>, %arg2: memref<128x128xbf16, #tpu.memory_space<vmem>>, %arg3: memref<1x128xf32, #tpu.memory_space<vmem>>, %arg4: memref<128x128xbf16, #tpu.memory_space<vmem>>, %arg5: memref<1x128xf32, #tpu.memory_space<vmem>>, %arg6: memref<128x128xbf16, #tpu.memory_space<vmem>>, %arg7: memref<128x128xbf16, #tpu.memory_space<vmem>>, %arg8: memref<1x128xf32, #tpu.memory_space<vmem>>, %arg9: memref<1x128xf32, #tpu.memory_space<vmem>>, %arg10: memref<16x128xf32, #tpu.memory_space<vmem>>, %arg11: memref<16x128xf32, #tpu.memory_space<vmem>>, %arg12: memref<16x128xf32, #tpu.memory_space<vmem>>, %arg13: memref<16x128xf32, #tpu.memory_space<vmem>>) attributes {dimension_semantics = [#tpu.dimension_semantics<parallel>], iteration_bounds = array<i64: 1>, scalar_prefetch = 0 : i64, scratch_operands = 0 : i64, tpu.core_type = #tpu.core_type<tc>, window_params = [{transform_indices = @transform_0, window_bounds = array<i64: 16, 128>}, {pipeline_mode = #tpu.pipeline_mode<synchronous>, transform_indices = @transform_1, window_bounds = array<i64: 128, 128>}, {pipeline_mode = #tpu.pipeline_mode<synchronous>, transform_indices = @transform_2, window_bounds = array<i64: 1, 128>}, {pipeline_mode = #tpu.pipeline_mode<synchronous>, transform_indices = @transform_3, window_bounds = array<i64: 128, 128>}, {pipeline_mode = #tpu.pipeline_mode<synchronous>, transform_indices = @transform_4, window_bounds = array<i64: 1, 128>}, {pipeline_mode = #tpu.pipeline_mode<synchronous>, transform_indices = @transform_5, window_bounds = array<i64: 128, 128>}, {pipeline_mode = #tpu.pipeline_mode<synchronous>, transform_indices = @transform_6, window_bounds = array<i64: 128, 128>}, {pipeline_mode = #tpu.pipeline_mode<synchronous>, transform_indices = @transform_7, window_bounds = array<i64: 1, 128>}, {pipeline_mode = #tpu.pipeline_mode<synchronous>, transform_indices = @transform_8, window_bounds = array<i64: 1, 128>}, {transform_indices = @transform_9, window_bounds = array<i64: 16, 128>}, {transform_indices = @transform_10, window_bounds = array<i64: 16, 128>}, {transform_indices = @transform_11, window_bounds = array<i64: 16, 128>}, {transform_indices = @transform_12, window_bounds = array<i64: 16, 128>}]} {
    %c0 = arith.constant 0 : index
    %c0_0 = arith.constant 0 : index
    %0 = vector.load %arg1[%c0, %c0_0] : memref<16x128xbf16, #tpu.memory_space<vmem>>, vector<16x128xbf16>
    %c0_1 = arith.constant 0 : index
    %c0_2 = arith.constant 0 : index
    %1 = vector.load %arg3[%c0_1, %c0_2] : memref<1x128xf32, #tpu.memory_space<vmem>>, vector<1x128xf32>
    %c0_3 = arith.constant 0 : index
    %c0_4 = arith.constant 0 : index
    %2 = vector.load %arg5[%c0_3, %c0_4] : memref<1x128xf32, #tpu.memory_space<vmem>>, vector<1x128xf32>
    %c0_5 = arith.constant 0 : index
    %c0_6 = arith.constant 0 : index
    %3 = vector.load %arg8[%c0_5, %c0_6] : memref<1x128xf32, #tpu.memory_space<vmem>>, vector<1x128xf32>
    %c0_7 = arith.constant 0 : index
    %c0_8 = arith.constant 0 : index
    %4 = vector.load %arg6[%c0_7, %c0_8] : memref<128x128xbf16, #tpu.memory_space<vmem>>, vector<128x128xbf16>
    %c0_9 = arith.constant 0 : index
    %c0_10 = arith.constant 0 : index
    %5 = vector.load %arg2[%c0_9, %c0_10] : memref<128x128xbf16, #tpu.memory_space<vmem>>, vector<128x128xbf16>
    %cst = arith.constant dense<0.000000e+00> : vector<16x128xf32>
    %6 = tpu.matmul %0, %5, %cst {dimension_numbers = #tpu.dot_dimension_numbers<[1], [0], [0], [1], [0, 0, 1, 1], [], []>} : vector<16x128xbf16>, vector<128x128xbf16>, vector<16x128xf32> -> vector<16x128xf32>
    %7 = vector.broadcast %1 : vector<1x128xf32> to vector<16x128xf32>
    %8 = arith.addf %6, %7 : vector<16x128xf32>
    %cst_11 = arith.constant 0.000000e+00 : f32
    %9 = vector.broadcast %cst_11 : f32 to vector<16x128xf32>
    %10 = arith.maximumf %8, %9 : vector<16x128xf32>
    %11 = arith.truncf %10 : vector<16x128xf32> to vector<16x128xbf16>
    %c0_12 = arith.constant 0 : index
    %c0_13 = arith.constant 0 : index
    %12 = vector.load %arg4[%c0_12, %c0_13] : memref<128x128xbf16, #tpu.memory_space<vmem>>, vector<128x128xbf16>
    %cst_14 = arith.constant dense<0.000000e+00> : vector<16x128xf32>
    %13 = tpu.matmul %11, %12, %cst_14 {dimension_numbers = #tpu.dot_dimension_numbers<[1], [0], [0], [1], [0, 0, 1, 1], [], []>} : vector<16x128xbf16>, vector<128x128xbf16>, vector<16x128xf32> -> vector<16x128xf32>
    %14 = vector.broadcast %2 : vector<1x128xf32> to vector<16x128xf32>
    %15 = arith.addf %13, %14 : vector<16x128xf32>
    %16 = arith.truncf %15 : vector<16x128xf32> to vector<16x128xbf16>
    %cst_15 = arith.constant dense<0.000000e+00> : vector<16x128xf32>
    %17 = tpu.matmul %16, %4, %cst_15 {dimension_numbers = #tpu.dot_dimension_numbers<[1], [1], [0], [0], [0, 0, 1, 0], [], []>} : vector<16x128xbf16>, vector<128x128xbf16>, vector<16x128xf32> -> vector<16x128xf32>
    %c0_16 = arith.constant 0 : index
    %c0_17 = arith.constant 0 : index
    %18 = vector.load %arg9[%c0_16, %c0_17] : memref<1x128xf32, #tpu.memory_space<vmem>>, vector<1x128xf32>
    %19 = vector.broadcast %18 : vector<1x128xf32> to vector<16x128xf32>
    %20 = arith.addf %17, %19 : vector<16x128xf32>
    %21 = tpu.iota {dimensions = array<i32: 1>} : vector<1x128xi32>
    %cst_18 = arith.constant dense<0xFF800000> : vector<16xf32>
    %22 = vector.multi_reduction <maximumf>, %20, %cst_18 [1] : vector<16x128xf32> to vector<16xf32>
    %23 = vector.shape_cast %22 : vector<16xf32> to vector<16x1xf32>
    %24 = vector.broadcast %23 : vector<16x1xf32> to vector<16x128xf32>
    %25 = arith.cmpf oeq, %20, %24 : vector<16x128xf32>
    %c128_i32 = arith.constant 128 : i32
    %26 = vector.shape_cast %21 : vector<1x128xi32> to vector<1x128xi32>
    %27 = vector.broadcast %26 : vector<1x128xi32> to vector<16x128xi32>
    %28 = vector.broadcast %c128_i32 : i32 to vector<16x128xi32>
    %29 = arith.select %25, %27, %28 : vector<16x128xi1>, vector<16x128xi32>
    %cst_19 = arith.constant dense<2147483647> : vector<16xi32>
    %30 = vector.multi_reduction <minsi>, %29, %cst_19 [1] : vector<16x128xi32> to vector<16xi32>
    %31 = vector.shape_cast %30 : vector<16xi32> to vector<16x1xi32>
    %32 = vector.broadcast %21 : vector<1x128xi32> to vector<16x128xi32>
    %33 = vector.broadcast %31 : vector<16x1xi32> to vector<16x128xi32>
    %34 = arith.cmpi eq, %32, %33 : vector<16x128xi32>
    %35 = arith.extui %34 : vector<16x128xi1> to vector<16x128xi32>
    %36 = arith.sitofp %35 : vector<16x128xi32> to vector<16x128xf32>
    %37 = arith.truncf %36 : vector<16x128xf32> to vector<16x128xbf16>
    %cst_20 = arith.constant dense<0.000000e+00> : vector<16x128xf32>
    %38 = tpu.matmul %37, %4, %cst_20 {dimension_numbers = #tpu.dot_dimension_numbers<[1], [0], [0], [1], [0, 0, 1, 1], [], []>} : vector<16x128xbf16>, vector<128x128xbf16>, vector<16x128xf32> -> vector<16x128xf32>
    %39 = arith.truncf %38 : vector<16x128xf32> to vector<16x128xbf16>
    %c0_21 = arith.constant 0 : index
    %c0_22 = arith.constant 0 : index
    %40 = vector.load %arg7[%c0_21, %c0_22] : memref<128x128xbf16, #tpu.memory_space<vmem>>, vector<128x128xbf16>
    %cst_23 = arith.constant dense<0.000000e+00> : vector<16x128xf32>
    %41 = tpu.matmul %39, %40, %cst_23 {dimension_numbers = #tpu.dot_dimension_numbers<[1], [0], [0], [1], [0, 0, 1, 1], [], []>} : vector<16x128xbf16>, vector<128x128xbf16>, vector<16x128xf32> -> vector<16x128xf32>
    %42 = vector.broadcast %3 : vector<1x128xf32> to vector<16x128xf32>
    %43 = arith.addf %41, %42 : vector<16x128xf32>
    %c0_24 = arith.constant 0 : index
    %c0_25 = arith.constant 0 : index
    %44 = vector.load %arg10[%c0_24, %c0_25] : memref<16x128xf32, #tpu.memory_space<vmem>>, vector<16x128xf32>
    tpu.vector_store %arg10[%c0_24, %c0_25], %43 {strides = array<i32>} : memref<16x128xf32, #tpu.memory_space<vmem>>, vector<16x128xf32>,
    %c0_26 = arith.constant 0 : index
    %c0_27 = arith.constant 0 : index
    %45 = vector.load %arg11[%c0_26, %c0_27] : memref<16x128xf32, #tpu.memory_space<vmem>>, vector<16x128xf32>
    tpu.vector_store %arg11[%c0_26, %c0_27], %15 {strides = array<i32>} : memref<16x128xf32, #tpu.memory_space<vmem>>, vector<16x128xf32>,
    %c0_28 = arith.constant 0 : index
    %c0_29 = arith.constant 0 : index
    %46 = vector.load %arg12[%c0_28, %c0_29] : memref<16x128xf32, #tpu.memory_space<vmem>>, vector<16x128xf32>
    tpu.vector_store %arg12[%c0_28, %c0_29], %38 {strides = array<i32>} : memref<16x128xf32, #tpu.memory_space<vmem>>, vector<16x128xf32>,
    %c0_30 = arith.constant 0 : index
    %c0_31 = arith.constant 0 : index
    %47 = vector.load %arg13[%c0_30, %c0_31] : memref<16x128xf32, #tpu.memory_space<vmem>>, vector<16x128xf32>
    tpu.vector_store %arg13[%c0_30, %c0_31], %20 {strides = array<i32>} : memref<16x128xf32, #tpu.memory_space<vmem>>, vector<16x128xf32>,
    return
  }
  func.func @transform_0(%arg0: i32) -> (i32, i32) {
    %c0_i32 = arith.constant 0 : i32
    %c0_i32_0 = arith.constant 0 : i32
    return %arg0, %c0_i32 : i32, i32
  }
  func.func @transform_1(%arg0: i32) -> (i32, i32) {
    %c0_i32 = arith.constant 0 : i32
    %c0_i32_0 = arith.constant 0 : i32
    %c0_i32_1 = arith.constant 0 : i32
    return %c0_i32, %c0_i32_0 : i32, i32
  }
  func.func @transform_2(%arg0: i32) -> (i32, i32) {
    %c0_i32 = arith.constant 0 : i32
    %c0_i32_0 = arith.constant 0 : i32
    %c0_i32_1 = arith.constant 0 : i32
    return %c0_i32, %c0_i32_0 : i32, i32
  }
  func.func @transform_3(%arg0: i32) -> (i32, i32) {
    %c0_i32 = arith.constant 0 : i32
    %c0_i32_0 = arith.constant 0 : i32
    %c0_i32_1 = arith.constant 0 : i32
    return %c0_i32, %c0_i32_0 : i32, i32
  }
  func.func @transform_4(%arg0: i32) -> (i32, i32) {
    %c0_i32 = arith.constant 0 : i32
    %c0_i32_0 = arith.constant 0 : i32
    %c0_i32_1 = arith.constant 0 : i32
    return %c0_i32, %c0_i32_0 : i32, i32
  }
  func.func @transform_5(%arg0: i32) -> (i32, i32) {
    %c0_i32 = arith.constant 0 : i32
    %c0_i32_0 = arith.constant 0 : i32
    %c0_i32_1 = arith.constant 0 : i32
    return %c0_i32, %c0_i32_0 : i32, i32
  }
  func.func @transform_6(%arg0: i32) -> (i32, i32) {
    %c0_i32 = arith.constant 0 : i32
    %c0_i32_0 = arith.constant 0 : i32
    %c0_i32_1 = arith.constant 0 : i32
    return %c0_i32, %c0_i32_0 : i32, i32
  }
  func.func @transform_7(%arg0: i32) -> (i32, i32) {
    %c0_i32 = arith.constant 0 : i32
    %c0_i32_0 = arith.constant 0 : i32
    %c0_i32_1 = arith.constant 0 : i32
    return %c0_i32, %c0_i32_0 : i32, i32
  }
  func.func @transform_8(%arg0: i32) -> (i32, i32) {
    %c0_i32 = arith.constant 0 : i32
    %c0_i32_0 = arith.constant 0 : i32
    %c0_i32_1 = arith.constant 0 : i32
    return %c0_i32, %c0_i32_0 : i32, i32
  }
  func.func @transform_9(%arg0: i32) -> (i32, i32) {
    %c0_i32 = arith.constant 0 : i32
    %c0_i32_0 = arith.constant 0 : i32
    return %arg0, %c0_i32 : i32, i32
  }
  func.func @transform_10(%arg0: i32) -> (i32, i32) {
    %c0_i32 = arith.constant 0 : i32
    %c0_i32_0 = arith.constant 0 : i32
    return %arg0, %c0_i32 : i32, i32
  }
  func.func @transform_11(%arg0: i32) -> (i32, i32) {
    %c0_i32 = arith.constant 0 : i32
    %c0_i32_0 = arith.constant 0 : i32
    return %arg0, %c0_i32 : i32, i32
  }
  func.func @transform_12(%arg0: i32) -> (i32, i32) {
    %c0_i32 = arith.constant 0 : i32
    %c0_i32_0 = arith.constant 0 : i32
    return %arg0, %c0_i32 : i32, i32
  }
}

</mosaic_0001>

<bundles_post_ra>
// kernel: tpu_custom_call.1
= control target key start
LH: loop header
LB: loop body
LE: loop exit
PB: predicated region body
PF: predicated region fallthrough
CT: control target
= control target key end

     0   :  { %18 = vsyncpa [#allocation3], 0  ;;  %s1353_s0 = inlined_call_operand.hbm [shape: bf16[16,128], index: 0, kind: input, shape index: {}]   ;;  %s1354_s1 = inlined_call_operand.hbm [shape: bf16[128,128], index: 1, kind: input, shape index: {}]   ;;  %s1355_s2 = inlined_call_operand.vmem [shape: f32[1,128], index: 2, kind: input, shape index: {}]   ;;  %s1356_s3 = inlined_call_operand.hbm [shape: bf16[128,128], index: 3, kind: input, shape index: {}]   ;;  %s1357_s4 = inlined_call_operand.vmem [shape: f32[1,128], index: 4, kind: input, shape index: {}]   ;;  %s1358_s5 = inlined_call_operand.hbm [shape: bf16[128,128], index: 5, kind: input, shape index: {}]   ;;  %s1359_s6 = inlined_call_operand.hbm [shape: bf16[128,128], index: 6, kind: input, shape index: {}]   ;;  %s1360_s7 = inlined_call_operand.vmem [shape: f32[1,128], index: 7, kind: input, shape index: {}]   ;;  %s1361_s8 = inlined_call_operand.vmem [shape: f32[1,128], index: 8, kind: input, shape index: {}]   ;;  %s1362_s9 = inlined_call_operand.hbm [shape: f32[16,128], index: 9, kind: output, shape index: {0}]   ;;  %s1363_s10 = inlined_call_operand.hbm [shape: f32[16,128], index: 10, kind: output, shape index: {1}]   ;;  %s1364_s11 = inlined_call_operand.hbm [shape: f32[16,128], index: 11, kind: output, shape index: {2}]   ;;  %s1365_s12 = inlined_call_operand.hbm [shape: f32[16,128], index: 12, kind: output, shape index: {3}]  }
   0x1   :  { %19 = vsyncpa [#allocation6], 0 }
   0x2   :  { %20 = vsyncpa [#allocation9], 0 }
   0x3   :  { %21 = vsyncpa [#allocation4], 0 }
   0x4   :  { %22 = vsyncpa [#allocation13], 0 }
   0x5   :  { %23 = vsyncpa [#allocation16], 0  ;;  %s1156_s21 = smov [#allocation5]   ;;  %s1157_s23 = smov [#allocation8]  }
   0x6   :  { %s41_s22 = sshll.u32 %s1156_s21, 4  ;;  %s69_s24 = sshll.u32 %s1157_s23, 4  ;;  %s42_s22 = int_to_ptr.vmem [resolvable:$true] %s41_s22  ;;  %s70_s24 = int_to_ptr.vmem [resolvable:$true] %s69_s24 }
   0x7   :  { %s972_s25 = scalar_lea.vmem %s42_s22, 1024  ;;  %p977_p1 = scmp.lt.s32.totalorder %s42_s22, %s42_s22 }
   0x8   :  { %p973_p0 = scmp.ne.s32.totalorder %s42_s22, %s972_s25  ;;  %p978_p2 = scmp.lt.s32.totalorder %s972_s25, %s972_s25 }
   0xa   :  { %p979_p3 = por %p978_p2, %p977_p1 }
   0xc   :  { %p980_p4 = pnand %p979_p3, %p973_p0 }
   0xe   :  { %983 = shalt.err (!%p980_p4)
}
   0xf   :  { %s1158_s26 = smov 64   ;;  %s1159_s27 = smov 4  }
  0x10   :  { %47 = dma.hbm_to_vmem [thread:$0]  %s1354_s1, 1024, %s42_s22, [#allocation6], %s1158_s26, %s1158_s26, %s1159_s27  }
  0x11   :  { %s992_s30 = scalar_lea.vmem %s70_s24, 1024  ;;  %p997_p6 = scmp.lt.s32.totalorder %s70_s24, %s70_s24 }
  0x12   :  { %p993_p5 = scmp.ne.s32.totalorder %s70_s24, %s992_s30  ;;  %p998_p7 = scmp.lt.s32.totalorder %s992_s30, %s992_s30 }
  0x14   :  { %p999_p8 = por %p998_p7, %p997_p6 }
  0x16   :  { %p1000_p9 = pnand %p999_p8, %p993_p5 }
  0x18   :  { %1003 = shalt.err (!%p1000_p9)
}
  0x19   :  { %75 = dma.hbm_to_vmem [thread:$0]  %s1358_s5, 1024, %s70_s24, [#allocation9], %s1158_s26, %s1158_s26, %s1159_s27  }
  0x1a   :  { %s1160_s15 = smov [#allocation2]   ;;  %s1161_s17 = smov [#allocation7]  }
  0x1b   :  { %s29_s16 = sshll.u32 %s1160_s15, 4  ;;  %s55_s18 = sshll.u32 %s1161_s17, 4  ;;  %s30_s16 = int_to_ptr.vmem [resolvable:$true] %s29_s16  ;;  %s56_s18 = int_to_ptr.vmem [resolvable:$true] %s55_s18 }
  0x1c   :  { %s1012_s1 = scalar_lea.vmem %s30_s16, 128  ;;  %p1017_p11 = scmp.lt.s32.totalorder %s30_s16, %s30_s16 }
  0x1d   :  { %p1013_p10 = scmp.ne.s32.totalorder %s30_s16, %s1012_s1  ;;  %p1018_p12 = scmp.lt.s32.totalorder %s1012_s1, %s1012_s1 }
  0x1f   :  { %p1019_p13 = por %p1018_p12, %p1017_p11 }
  0x21   :  { %p1020_p0 = pnand %p1019_p13, %p1013_p10 }
  0x23   :  { %1023 = shalt.err (!%p1020_p0)
}
  0x24   :  { %35 = dma.hbm_to_vmem [thread:$0]  %s1353_s0, 128, %s30_s16, [#allocation3], %s1158_s26, %s1158_s26, %s1159_s27  }
  0x25   :  { %s1032_s5 = scalar_lea.vmem %s56_s18, 1024  ;;  %p1037_p2 = scmp.lt.s32.totalorder %s56_s18, %s56_s18 }
  0x26   :  { %p1033_p1 = scmp.ne.s32.totalorder %s56_s18, %s1032_s5  ;;  %p1038_p3 = scmp.lt.s32.totalorder %s1032_s5, %s1032_s5 }
  0x28   :  { %p1039_p4 = por %p1038_p3, %p1037_p2 }
  0x2a   :  { %p1040_p5 = pnand %p1039_p4, %p1033_p1 }
  0x2c   :  { %1043 = shalt.err (!%p1040_p5)
}
  0x2d   :  { %61 = dma.hbm_to_vmem [thread:$0]  %s1356_s3, 1024, %s56_s18, [#allocation6], %s1158_s26, %s1158_s26, %s1159_s27  }
  0x2e   :  { %s1162_s23 = smov [#allocation10]  }
  0x2f   :  { %s81_s24 = sshll.u32 %s1162_s23, 4  ;;  %s82_s24 = int_to_ptr.vmem [resolvable:$true] %s81_s24 }
  0x30   :  { %s1052_s25 = scalar_lea.vmem %s82_s24, 1024  ;;  %p1057_p7 = scmp.lt.s32.totalorder %s82_s24, %s82_s24 }
  0x31   :  { %p1053_p6 = scmp.ne.s32.totalorder %s82_s24, %s1052_s25  ;;  %p1058_p8 = scmp.lt.s32.totalorder %s1052_s25, %s1052_s25 }
  0x33   :  { %p1059_p9 = por %p1058_p8, %p1057_p7 }
  0x35   :  { %p1060_p10 = pnand %p1059_p9, %p1053_p6 }
  0x37   :  { %1063 = shalt.err (!%p1060_p10)
}
  0x38   :  { %87 = dma.hbm_to_vmem [thread:$0]  %s1359_s6, 1024, %s82_s24, [#allocation9], %s1158_s26, %s1158_s26, %s1159_s27  }
  0x39   :  { %1144 = dma.done.wait [#allocation3], 128  }
  0x3a   :  { %1145 = vsyncadd [#allocation3], 4294967168 }
  0x3b   :  { %1146 = dma.done.wait [#allocation6], 2048  }
  0x3c   :  { %1147 = vsyncadd [#allocation6], 4294965248 }
  0x3d   :  { %1148 = dma.done.wait [#allocation9], 2048  }
  0x3e   :  { %1149 = vsyncadd [#allocation9], 4294965248  ;;  %v1163_v0 = vmov 0.0   ;;  %vm1164_vm0 = vmmov 0   ;;  %v931_v1 = vld [vmem:[#allocation5 + $0x38] sm:$0xff]   ;;  %v932_v2 = vld [vmem:[#allocation5 + $0x30] sm:$0xff]   ;;  %v457_v51 = vlaneseq }
  0x3f   :  { %815 = vmatprep.subr.bf16.mxu0 %v1163_v0  ;;  %831 = vmatprep.mubr.msk.bf16.mxu0 %vm1164_vm0, %v1163_v0  ;;  %v933_v3 = vld [vmem:[#allocation5 + $0x28] sm:$0xff]   ;;  %v940_v4 = vld [vmem:[#allocation7 + $0x38] sm:$0xff]   ;;  %v934_v5 = vld [vmem:[#allocation5 + $0x20] sm:$0xff]  }
  0x40   :  { %835 = vmatprep.subr.bf16.mxu1 %v1163_v0  ;;  %851 = vmatprep.mubr.msk.bf16.mxu1 %vm1164_vm0, %v1163_v0  ;;  %v941_v6 = vld [vmem:[#allocation7 + $0x30] sm:$0xff]   ;;  %v935_v7 = vld [vmem:[#allocation5 + $0x18] sm:$0xff]   ;;  %v942_v8 = vld [vmem:[#allocation7 + $0x28] sm:$0xff]   ;;  %v458_v52 = vand.u32 127, %v457_v51 }
  0x41   :  { %816 = vmatpush3.bf16.msra.mxu0 %v931_v1  ;;  %836 = vmatpush3.bf16.msra.mxu1 %v940_v4  ;;  %v936_v9 = vld [vmem:[#allocation5 + $0x10] sm:$0xff]   ;;  %v943_v10 = vld [vmem:[#allocation7 + $0x20] sm:$0xff]   ;;  %v937_v11 = vld [vmem:[#allocation5 + $0x8] sm:$0xff]  }
  0x42   :  { %817 = vmatprep.subr.bf16.mxu0 %v1163_v0  ;;  %837 = vmatprep.subr.bf16.mxu1 %v1163_v0  ;;  %v944_v12 = vld [vmem:[#allocation7 + $0x18] sm:$0xff]   ;;  %v938_v13 = vld [vmem:[#allocation5] sm:$0xff]   ;;  %v945_v15 = vld [vmem:[#allocation7 + $0x10] sm:$0xff]  }
  0x43   :  { %v939_v14 = vld [vmem:[#allocation2] sm:$0xff]   ;;  %v946_v16 = vld [vmem:[#allocation7 + $0x8] sm:$0xff]   ;;  %v947_v17 = vld [vmem:[#allocation7] sm:$0xff]  }
  0x44   :  { %v948_v18 = vld [vmem:[#allocation8 + $0x38] sm:$0xff]   ;;  %v949_v19 = vld [vmem:[#allocation8 + $0x30] sm:$0xff]   ;;  %v950_v20 = vld [vmem:[#allocation8 + $0x28] sm:$0xff]  }
  0x45   :  { %818 = vmatpush3.bf16.msra.mxu0 %v932_v2  ;;  %838 = vmatpush3.bf16.msra.mxu1 %v941_v6  ;;  %v951_v21 = vld [vmem:[#allocation8 + $0x20] sm:$0xff]   ;;  %v952_v22 = vld [vmem:[#allocation8 + $0x18] sm:$0xff]   ;;  %v953_v23 = vld [vmem:[#allocation8 + $0x10] sm:$0xff]  }
  0x46   :  { %819 = vmatprep.subr.bf16.mxu0 %v1163_v0  ;;  %839 = vmatprep.subr.bf16.mxu1 %v1163_v0  ;;  %v954_v24 = vld [vmem:[#allocation8 + $0x8] sm:$0xff]   ;;  %v729_v25 = vld [vmem:[%s1355_s2] ss:$0 sm:$0xff]  ;;  %v955_v35 = vld [vmem:[#allocation8] sm:$0xff]  }
  0x47   :  { %v739_v36 = vld [vmem:[%s1357_s4] ss:$0 sm:$0xff]  ;;  %s1166_s4 = smov [#allocation12]  }
  0x48   :  { %v748_v44 = vld [vmem:[%s1361_s8] ss:$0 sm:$0xff]  ;;  %s680_s8 = sshll.u32 %s1166_s4, 4  ;;  %s681_s8 = int_to_ptr.vmem [resolvable:$true] %s680_s8 }
  0x49   :  { %820 = vmatpush3.bf16.msra.mxu0 %v933_v3  ;;  %840 = vmatpush3.bf16.msra.mxu1 %v942_v8  ;;  %s1064_s30 = scalar_lea.vmem %s681_s8, 256  ;;  %p1069_p12 = scmp.lt.s32.totalorder %s681_s8, %s681_s8 }
  0x4a   :  { %821 = vmatprep.subr.bf16.mxu0 %v1163_v0  ;;  %841 = vmatprep.subr.bf16.mxu1 %v1163_v0  ;;  %p1065_p11 = scmp.ne.s32.totalorder %s681_s8, %s1064_s30  ;;  %p1070_p13 = scmp.lt.s32.totalorder %s1064_s30, %s1064_s30 }
  0x4c   :  { %p1071_p0 = por %p1070_p13, %p1069_p12 }
  0x4d   :  { %822 = vmatpush3.bf16.msra.mxu0 %v934_v5  ;;  %842 = vmatpush3.bf16.msra.mxu1 %v943_v10 }
  0x4e   :  { %823 = vmatprep.subr.bf16.mxu0 %v1163_v0  ;;  %843 = vmatprep.subr.bf16.mxu1 %v1163_v0  ;;  %p1072_p1 = pnand %p1071_p0, %p1065_p11 }
  0x51   :  { %824 = vmatpush3.bf16.msra.mxu0 %v935_v7  ;;  %844 = vmatpush3.bf16.msra.mxu1 %v944_v12 }
  0x52   :  { %825 = vmatprep.subr.bf16.mxu0 %v1163_v0  ;;  %845 = vmatprep.subr.bf16.mxu1 %v1163_v0 }
  0x55   :  { %826 = vmatpush3.bf16.msra.mxu0 %v936_v9  ;;  %846 = vmatpush3.bf16.msra.mxu1 %v945_v15 }
  0x56   :  { %827 = vmatprep.subr.bf16.mxu0 %v1163_v0  ;;  %847 = vmatprep.subr.bf16.mxu1 %v1163_v0 }
  0x59   :  { %828 = vmatpush3.bf16.msra.mxu0 %v937_v11  ;;  %848 = vmatpush3.bf16.msra.mxu1 %v946_v16  ;;  %v956_v16 = vld [vmem:[#allocation10 + $0x38] sm:$0xff]  }
  0x5a   :  { %829 = vmatprep.subr.bf16.mxu0 %v1163_v0  ;;  %849 = vmatprep.subr.bf16.mxu1 %v1163_v0 }
  0x5d   :  { %830 = vmatpush3.bf16.msra.mxu0 %v938_v13  ;;  %850 = vmatpush3.bf16.msra.mxu1 %v947_v17  ;;  %v1165_v17 = vmov 1.0|1.0  }
  0x5e   :  { %855 = vmatprep.subr.bf16.mxu0 %v1163_v0  ;;  %875 = vmatprep.subr.bf16.mxu1 %v1163_v0 }
  0x60   :  { %832 = vmatmul.mubr.bf16.vlgmr.msra.gmra.mxu0 %v939_v14 }
  0x61   :  { %871 = vmatprep.mubr.msk.bf16.mxu0 %vm1164_vm0, %v1163_v0  ;;  %856 = vmatpush3.bf16.xpose.msra.mxu0 %v948_v18 }
  0x62   :  { %857 = vmatprep.subr.bf16.mxu0 %v1163_v0 }
  0x69   :  { %858 = vmatpush3.bf16.xpose.msra.mxu0 %v949_v19 }
  0x6a   :  { %859 = vmatprep.subr.bf16.mxu0 %v1163_v0 }
  0x71   :  { %860 = vmatpush3.bf16.xpose.msra.mxu0 %v950_v20 }
  0x72   :  { %861 = vmatprep.subr.bf16.mxu0 %v1163_v0 }
  0x79   :  { %862 = vmatpush3.bf16.xpose.msra.mxu0 %v951_v21 }
  0x7a   :  { %863 = vmatprep.subr.bf16.mxu0 %v1163_v0 }
  0x81   :  { %864 = vmatpush3.bf16.xpose.msra.mxu0 %v952_v22 }
  0x82   :  { %865 = vmatprep.subr.bf16.mxu0 %v1163_v0 }
  0x89   :  { %866 = vmatpush3.bf16.xpose.msra.mxu0 %v953_v23 }
  0x8a   :  { %867 = vmatprep.subr.bf16.mxu0 %v1163_v0 }
  0x91   :  { %868 = vmatpush3.bf16.xpose.msra.mxu0 %v954_v24 }
  0x92   :  { %869 = vmatprep.subr.bf16.mxu0 %v1163_v0 }
  0x99   :  { %870 = vmatpush3.bf16.xpose.msra.mxu0 %v955_v35 }
 0x120   :  { %v239_v26 = vpop.f32.mrf.mxu0 }
 0x121   :  { %v240_v28 = vadd.f32 %v729_v25, %v239_v26 }
 0x122   :  { %v833_v27 = vpop.f32.mrf.mxu0 }
 0x123   :  { %v246_v32 = vmax.f32 %v240_v28, 0.0 }
 0x124   :  { %v242_v29 = vpop.f32.mrf.mxu0 }
 0x125   :  { %v243_v30 = vadd.f32 %v729_v25, %v242_v29 }
 0x126   :  { %v834_v31 = vpop.f32.mrf.mxu0 }
 0x127   :  { %v247_v33 = vmax.f32 %v243_v30, 0.0 }
 0x129   :  { %v248_v34 = vpack.c.bf16 %v247_v33, %v246_v32 }
 0x12b   :  { %852 = vmatmul.mubr.bf16.vlgmr.msra.gmra.mxu1 %v248_v34 }
 0x12c   :  { %876 = vmatpush3.bf16.msra.mxu1 %v948_v18  ;;  %891 = vmatprep.mubr.msk.bf16.mxu1 %vm1164_vm0, %v1163_v0  ;;  %v957_v18 = vld [vmem:[#allocation10 + $0x30] sm:$0xff]  }
 0x12d   :  { %877 = vmatprep.subr.bf16.mxu1 %v1163_v0 }
 0x130   :  { %878 = vmatpush3.bf16.msra.mxu1 %v949_v19  ;;  %v958_v19 = vld [vmem:[#allocation10 + $0x28] sm:$0xff]  }
 0x131   :  { %879 = vmatprep.subr.bf16.mxu1 %v1163_v0 }
 0x134   :  { %880 = vmatpush3.bf16.msra.mxu1 %v950_v20  ;;  %v959_v20 = vld [vmem:[#allocation10 + $0x20] sm:$0xff]  }
 0x135   :  { %881 = vmatprep.subr.bf16.mxu1 %v1163_v0 }
 0x138   :  { %882 = vmatpush3.bf16.msra.mxu1 %v951_v21  ;;  %v960_v21 = vld [vmem:[#allocation10 + $0x18] sm:$0xff]  }
 0x139   :  { %883 = vmatprep.subr.bf16.mxu1 %v1163_v0 }
 0x13c   :  { %884 = vmatpush3.bf16.msra.mxu1 %v952_v22  ;;  %v961_v22 = vld [vmem:[#allocation10 + $0x10] sm:$0xff]  }
 0x13d   :  { %885 = vmatprep.subr.bf16.mxu1 %v1163_v0 }
 0x140   :  { %886 = vmatpush3.bf16.msra.mxu1 %v953_v23  ;;  %v962_v23 = vld [vmem:[#allocation10 + $0x8] sm:$0xff]  }
 0x141   :  { %887 = vmatprep.subr.bf16.mxu1 %v1163_v0 }
 0x144   :  { %888 = vmatpush3.bf16.msra.mxu1 %v954_v24  ;;  %v963_v24 = vld [vmem:[#allocation10] sm:$0xff]  }
 0x145   :  { %889 = vmatprep.subr.bf16.mxu1 %v1163_v0 }
 0x148   :  { %890 = vmatpush3.bf16.msra.mxu1 %v955_v35 }
 0x149   :  { %895 = vmatprep.subr.bf16.mxu1 %v1163_v0 }
 0x1eb   :  { %v353_v37 = vpop.f32.mrf.mxu1 }
 0x1ec   :  { %v354_v38 = vadd.f32 %v739_v36, %v353_v37 }
 0x1ed   :  { %v853_v39 = vpop.f32.mrf.mxu1 }
 0x1ee   :  { %657 = vst [vmem:[#allocation12] sm:$0xff] %v354_v38 }
 0x1ef   :  { %v356_v40 = vpop.f32.mrf.mxu1 }
 0x1f0   :  { %v357_v41 = vadd.f32 %v739_v36, %v356_v40 }
 0x1f1   :  { %v854_v42 = vpop.f32.mrf.mxu1 }
 0x1f2   :  { %v360_v43 = vpack.c.bf16 %v357_v41, %v354_v38  ;;  %658 = vst [vmem:[#allocation12 + $0x8] sm:$0xff] %v357_v41 }
 0x1f4   :  { %872 = vmatmul.mubr.bf16.vlgmr.msra.gmra.mxu0 %v360_v43 }
 0x2b4   :  { %v450_v45 = vpop.f32.mrf.mxu0 }
 0x2b5   :  { %v451_v46 = vadd.f32 %v748_v44, %v450_v45 }
 0x2b6   :  { %v873_v47 = vpop.f32.mrf.mxu0 }
 0x2b7   :  { %661 = vst [vmem:[#allocation15] sm:$0xff] %v451_v46  ;;  %459 = vmax.xlane.f32.xlu0 %v451_v46 }
 0x2b8   :  { %v453_v48 = vpop.f32.mrf.mxu0 }
 0x2b9   :  { %v454_v49 = vadd.f32 %v748_v44, %v453_v48 }
 0x2ba   :  { %v874_v50 = vpop.f32.mrf.mxu0 }
 0x2bb   :  { %662 = vst [vmem:[#allocation15 + $0x8] sm:$0xff] %v454_v49  ;;  %461 = vmax.xlane.f32.xlu0 %v454_v49 }
 0x340   :  { %v460_v53 = vpop.xlane.xlu0 %459 }
 0x341   :  { %vm463_vm1 = vcmp.eq.f32.partialorder %v451_v46, %v460_v53 }
 0x342   :  { %v465_v54 = vsel %vm463_vm1, %v458_v52, 128 }
 0x343   :  { %v468_v55 = vshra.s32 %v465_v54, 16  ;;  %v467_v61 = vand.u32 65535, %v465_v54 }
 0x344   :  { %v462_v56 = vpop.xlane.xlu0 %461 }
 0x345   :  { %vm464_vm2 = vcmp.eq.f32.partialorder %v454_v49, %v462_v56  ;;  %v470_v57 = vcvt.s32.f32 %v468_v55  ;;  %v469_v1 = vcvt.s32.f32 %v467_v61 }
 0x346   :  { %v466_v58 = vsel %vm464_vm2, %v458_v52, 128 }
 0x347   :  { %471 = vmin.xlane.f32.xlu1 %v470_v57  ;;  %v482_v59 = vshra.s32 %v466_v58, 16  ;;  %v481_v62 = vand.u32 65535, %v466_v58 }
 0x349   :  { %v484_v60 = vcvt.s32.f32 %v482_v59  ;;  %v483_v4 = vcvt.s32.f32 %v481_v62 }
 0x34b   :  { %485 = vmin.xlane.f32.xlu1 %v484_v60 }
 0x3d0   :  { %v472_v63 = vpop.xlane.xlu1 %471 }
 0x3d1   :  { %vm473_vm3 = vcmp.eq.f32.partialorder %v470_v57, %v472_v63  ;;  %v478_v6 = vcvt.f32.s32 %v472_v63 }
 0x3d2   :  { %v474_v2 = vsel %vm473_vm3, %v469_v1, inf }
 0x3d3   :  { %475 = vmin.xlane.f32.xlu0 %v474_v2  ;;  %v479_v10 = vshll.u32 %v478_v6, 16 }
 0x3d4   :  { %v486_v3 = vpop.xlane.xlu1 %485 }
 0x3d5   :  { %vm487_vm4 = vcmp.eq.f32.partialorder %v484_v60, %v486_v3  ;;  %v492_v8 = vcvt.f32.s32 %v486_v3 }
 0x3d6   :  { %v488_v5 = vsel %vm487_vm4, %v483_v4, inf }
 0x3d7   :  { %489 = vmin.xlane.f32.xlu1 %v488_v5  ;;  %v493_v12 = vshll.u32 %v492_v8, 16 }
 0x45c   :  { %v476_v7 = vpop.xlane.xlu0 %475 }
 0x45d   :  { %v477_v9 = vcvt.f32.s32 %v476_v7 }
 0x45f   :  { %v480_v13 = vadd.s32 %v479_v10, %v477_v9 }
 0x460   :  { %v490_v11 = vpop.xlane.xlu1 %489 }
 0x461   :  { %v491_v14 = vcvt.f32.s32 %v490_v11  ;;  %vm495_vm5 = vcmp.eq.s32.totalorder %v458_v52, %v480_v13 }
 0x463   :  { %v494_v15 = vadd.s32 %v493_v12, %v491_v14 }
 0x465   :  { %vm496_vm6 = vcmp.eq.s32.totalorder %v458_v52, %v494_v15 }
 0x466   :  { %vm759_vm7 = vmpackc.low %vm496_vm6, %vm495_vm5 }
 0x467   :  { %892 = vmatmul.mubr.msk.bf16.vlgmr.msra.gmra.mxu1 %vm759_vm7, %v1165_v17 }
 0x468   :  { %896 = vmatpush3.bf16.msra.mxu1 %v956_v16  ;;  %911 = vmatprep.mubr.msk.bf16.mxu1 %vm1164_vm0, %v1163_v0 }
 0x469   :  { %897 = vmatprep.subr.bf16.mxu1 %v1163_v0 }
 0x46c   :  { %898 = vmatpush3.bf16.msra.mxu1 %v957_v18 }
 0x46d   :  { %899 = vmatprep.subr.bf16.mxu1 %v1163_v0 }
 0x470   :  { %900 = vmatpush3.bf16.msra.mxu1 %v958_v19 }
 0x471   :  { %901 = vmatprep.subr.bf16.mxu1 %v1163_v0 }
 0x474   :  { %902 = vmatpush3.bf16.msra.mxu1 %v959_v20 }
 0x475   :  { %903 = vmatprep.subr.bf16.mxu1 %v1163_v0 }
 0x478   :  { %904 = vmatpush3.bf16.msra.mxu1 %v960_v21 }
 0x479   :  { %905 = vmatprep.subr.bf16.mxu1 %v1163_v0 }
 0x47c   :  { %906 = vmatpush3.bf16.msra.mxu1 %v961_v22 }
 0x47d   :  { %907 = vmatprep.subr.bf16.mxu1 %v1163_v0 }
 0x480   :  { %908 = vmatpush3.bf16.msra.mxu1 %v962_v23 }
 0x481   :  { %909 = vmatprep.subr.bf16.mxu1 %v1163_v0 }
 0x484   :  { %910 = vmatpush3.bf16.msra.mxu1 %v963_v24 }
 0x527   :  { %v536_v25 = vpop.f32.mrf.mxu1 }
 0x528   :  { %659 = vst [vmem:[#allocation14] sm:$0xff] %v536_v25 }
 0x529   :  { %v893_v26 = vpop.f32.mrf.mxu1 }
 0x52b   :  { %v539_v27 = vpop.f32.mrf.mxu1 }
 0x52c   :  { %v543_v28 = vpack.c.bf16 %v539_v27, %v536_v25  ;;  %660 = vst [vmem:[#allocation14 + $0x8] sm:$0xff] %v539_v27 }
 0x52d   :  { %v894_v29 = vpop.f32.mrf.mxu1 }
 0x52e   :  { %912 = vmatmul.mubr.bf16.vlgmr.msra.gmra.mxu1 %v543_v28 }
 0x52f   :  { %1075 = shalt.err (!%p1072_p1)
}
 0x530   :  { %s1167_s13 = smov 128   ;;  %s1168_s14 = smov 8  }
 0x531   :  { %686 = dma.vmem_to_hbm [thread:$0]  %s681_s8, 256, %s1363_s10, [#allocation13], %s1167_s13, %s1167_s13, %s1168_s14  }
 0x532   :  { %s1169_s17 = smov [#allocation14]   ;;  %s1170_s1 = smov [#allocation15]  }
 0x533   :  { %s692_s18 = sshll.u32 %s1169_s17, 4  ;;  %s704_s19 = sshll.u32 %s1170_s1, 4  ;;  %s693_s18 = int_to_ptr.vmem [resolvable:$true] %s692_s18  ;;  %s705_s19 = int_to_ptr.vmem [resolvable:$true] %s704_s19 }
 0x534   :  { %s1084_s20 = scalar_lea.vmem %s693_s18, 256  ;;  %p1089_p3 = scmp.lt.s32.totalorder %s693_s18, %s693_s18 }
 0x535   :  { %p1085_p2 = scmp.ne.s32.totalorder %s693_s18, %s1084_s20  ;;  %p1090_p4 = scmp.lt.s32.totalorder %s1084_s20, %s1084_s20 }
 0x537   :  { %p1091_p5 = por %p1090_p4, %p1089_p3 }
 0x539   :  { %p1092_p6 = pnand %p1091_p5, %p1085_p2 }
 0x53b   :  { %1095 = shalt.err (!%p1092_p6)
}
 0x53c   :  { %698 = dma.vmem_to_hbm [thread:$0]  %s693_s18, 256, %s1364_s11, [#allocation13], %s1167_s13, %s1167_s13, %s1168_s14  }
 0x53d   :  { %s1104_s10 = scalar_lea.vmem %s705_s19, 256  ;;  %p1109_p8 = scmp.lt.s32.totalorder %s705_s19, %s705_s19 }
 0x53e   :  { %p1105_p7 = scmp.ne.s32.totalorder %s705_s19, %s1104_s10  ;;  %p1110_p9 = scmp.lt.s32.totalorder %s1104_s10, %s1104_s10 }
 0x540   :  { %p1111_p10 = por %p1110_p9, %p1109_p8 }
 0x542   :  { %p1112_p11 = pnand %p1111_p10, %p1105_p7 }
 0x544   :  { %1115 = shalt.err (!%p1112_p11)
}
 0x545   :  { %710 = dma.vmem_to_hbm [thread:$0]  %s705_s19, 256, %s1365_s12, [#allocation16], %s1167_s13, %s1167_s13, %s1168_s14  }
 0x546   :  { %v761_v0 = vld [vmem:[%s1360_s7] ss:$0 sm:$0xff]  ;;  %s1171_s11 = smov [#allocation11]  }
 0x547   :  { %s668_s0 = sshll.u32 %s1171_s11, 4  ;;  %s669_s0 = int_to_ptr.vmem [resolvable:$true] %s668_s0 }
 0x548   :  { %s1124_s28 = scalar_lea.vmem %s669_s0, 256  ;;  %p1129_p13 = scmp.lt.s32.totalorder %s669_s0, %s669_s0 }
 0x549   :  { %p1125_p12 = scmp.ne.s32.totalorder %s669_s0, %s1124_s28  ;;  %p1130_p0 = scmp.lt.s32.totalorder %s1124_s28, %s1124_s28 }
 0x54b   :  { %p1131_p1 = por %p1130_p0, %p1129_p13 }
 0x54d   :  { %p1132_p2 = pnand %p1131_p1, %p1125_p12 }
 0x5ee   :  { %v648_v30 = vpop.f32.mrf.mxu1 }
 0x5ef   :  { %v649_v31 = vadd.f32 %v761_v0, %v648_v30 }
 0x5f0   :  { %v913_v32 = vpop.f32.mrf.mxu1 }
 0x5f1   :  { %655 = vst [vmem:[#allocation11] sm:$0xff] %v649_v31 }
 0x5f2   :  { %v651_v33 = vpop.f32.mrf.mxu1 }
 0x5f3   :  { %v652_v34 = vadd.f32 %v761_v0, %v651_v33 }
 0x5f4   :  { %v914_v35 = vpop.f32.mrf.mxu1 }
 0x5f5   :  { %656 = vst [vmem:[#allocation11 + $0x8] sm:$0xff] %v652_v34 }
 0x5f6   :  { %1135 = shalt.err (!%p1132_p2)
}
 0x5f7   :  { %674 = dma.vmem_to_hbm [thread:$0]  %s669_s0, 256, %s1362_s9, [#allocation4], %s1167_s13, %s1167_s13, %s1168_s14  }
 0x5f8   :  { %1150 = dma.done.wait [#allocation4], 256  }
 0x5f9   :  { %1151 = vsyncadd [#allocation4], 4294967040 }
 0x5fa   :  { %1152 = dma.done.wait [#allocation13], 512  }
 0x5fb   :  { %1153 = vsyncadd [#allocation13], 4294966784 }
 0x5fc   :  { %1154 = dma.done.wait [#allocation16], 256  }
 0x5fd   :  { %1155 = vsyncadd [#allocation16], 4294967040 }
 0x5fe   :  { %723 = vsyncpa [#allocation3], 1 }
 0x5ff   :  { %724 = vsyncpa [#allocation6], 1 }
 0x600   :  { %725 = vsyncpa [#allocation9], 1 }
 0x601   :  { %726 = vsyncpa [#allocation4], 1 }
 0x602   :  { %727 = vsyncpa [#allocation13], 1 }
 0x603   :  { %728 = vsyncpa [#allocation16], 1 }

</bundles_post_ra>
